<compile_context>
chip_gen: v6e
topology: v6e:2x2x1
jax: 0.10.0
libtpu: 0.0.40
codegen_flags: <defaults>
</compile_context>

<pallas_src>
import functools

import jax
import jax.numpy as jnp
from jax.experimental import pallas as pl
from jax.experimental.pallas import tpu as pltpu


def _expert_linear_kernel(x_ref, w_ref, o_ref, acc_ref, *, slots):
    # Kernel views (expert axis squeezed; slot axis also squeezed when slots==1):
    #   x_ref:   (tn, slots, tc) or (tn, tc)   activation tile
    #   w_ref:   (tc, to)                      expert-e weight tile, (K, N) layout
    #   o_ref:   (tn, slots, to) or (tn, to)   output tile (resident across K axis)
    #   acc_ref: same shape as o_ref, f32 accumulator scratch
    k = pl.program_id(3)

    @pl.when(k == 0)
    def _init():
        acc_ref[...] = jnp.zeros_like(acc_ref)

    w = w_ref[...]  # (tc, to); reused by every slot below
    if slots == 1:
        acc_ref[...] += jnp.dot(x_ref[...], w, preferred_element_type=jnp.float32)
    else:
        # slots_per_expert is small in SoftMoE; unroll so each iteration is a
        # canonical 2-D (tn, tc) x (tc, to) MXU matmul (no in-kernel transposes).
        for si in range(slots):
            acc_ref[:, si, :] += jnp.dot(
                x_ref[:, si, :], w, preferred_element_type=jnp.float32
            )

    @pl.when(k == pl.num_programs(3) - 1)
    def _write():
        o_ref[...] = acc_ref[...].astype(o_ref.dtype)


def _pick_lane_tile(dim, max_tile=512):
    # Lane-dim tile: a multiple of 128 that divides `dim`, else the full dim
    # (full-extent blocks are always legal).
    for t in range(max_tile, 127, -128):
        if dim % t == 0:
            return t
    return dim


def _pick_batch_tile(n, slots, target_rows=256):
    # Aim for ~target_rows MXU rows per expert tile (tn * slots).
    t = max(1, min(n, target_rows // max(slots, 1)))
    while n % t:
        t -= 1
    return t


def expert_linear(x, weight, *, tile_n=None, tile_c=None, tile_o=None):
    """x: (N, S, C), weight: (E, O, C) -> (N, S, O).

    Bias is not applied (the PyTorch forward never uses it)."""
    N, S, C = x.shape
    E, O, Cw = weight.shape
    assert C == Cw and S % E == 0
    s = S // E

    tn = tile_n if tile_n is not None else _pick_batch_tile(N, s)
    tc = tile_c if tile_c is not None else _pick_lane_tile(C)
    to = tile_o if tile_o is not None else _pick_lane_tile(O)
    assert N % tn == 0
    assert C % tc == 0 and (tc == C or tc % 128 == 0)
    assert O % to == 0 and (to == O or to % 128 == 0)
    # NOTE: for production sizes O should be a multiple of 128 so output
    # stores are lane-dense (unmasked vst).

    # 'n (e s) c -> n e s c': contiguous reshape, no HBM data movement.
    x4 = x.reshape(N, E, s, C)
    # One-time layout change (E, O, C) -> (E, C, O) so the MXU is fed in
    # canonical (M, K) x (K, N) form.  In a real model, do this at load time.
    w_t = jnp.swapaxes(weight, 1, 2)

    if s == 1:
        # Fast path: squeeze the slot axis too -> pure 2-D matmul tiles.
        x_spec = pl.BlockSpec((tn, None, None, tc), lambda e, i, j, k: (i, e, 0, k))
        o_spec = pl.BlockSpec((tn, None, None, to), lambda e, i, j, k: (i, e, 0, j))
        acc_shape = (tn, to)
    else:
        # Expert axis is a squeezed (size-1) block dim -> kernel sees (tn, s, tc).
        x_spec = pl.BlockSpec((tn, None, s, tc), lambda e, i, j, k: (i, e, 0, k))
        o_spec = pl.BlockSpec((tn, None, s, to), lambda e, i, j, k: (i, e, 0, j))
        acc_shape = (tn, s, to)

    # Weight block is independent of the batch-tile index i -> kernel sees (tc, to).
    w_spec = pl.BlockSpec((None, tc, to), lambda e, i, j, k: (e, k, j))

    grid = (E, N // tn, O // to, C // tc)
    kernel = functools.partial(_expert_linear_kernel, slots=s)
    itemsize = x.dtype.itemsize

    out4 = pl.pallas_call(
        kernel,
        out_shape=jax.ShapeDtypeStruct((N, E, s, O), x.dtype),
        grid_spec=pltpu.PrefetchScalarGridSpec(
            num_scalar_prefetch=0,
            grid=grid,
            in_specs=[x_spec, w_spec],
            out_specs=o_spec,
            scratch_shapes=[pltpu.VMEM(acc_shape, jnp.float32)],
        ),
        compiler_params=pltpu.CompilerParams(
            dimension_semantics=("parallel", "parallel", "parallel", "arbitrary"),
        ),
        cost_estimate=pl.CostEstimate(
            flops=2 * E * (N * s) * C * O,
            transcendentals=0,
            bytes_accessed=(x.size + weight.size + N * S * O) * itemsize,
        ),
    )(x4, w_t)

    # 'n e s o -> n (e s) o': contiguous reshape, no HBM data movement.
    return out4.reshape(N, S, O)


def _reference(x, weight):
    N, S, C = x.shape
    E, O, _ = weight.shape
    s = S // E
    return jnp.einsum(
        "nesc,eoc->neso",
        x.reshape(N, E, s, C),
        weight,
        precision=jax.lax.Precision.HIGHEST,
    ).reshape(N, S, O)


if __name__ == "__main__":
    key = jax.random.PRNGKey(0)

    # --- Case 1: slots_per_expert = 2 (general path), explicit small tiles so
    # the grid covers E x M-tiles x O-tiles x K-tiles (incl. K accumulation). ---
    num_experts, slots_per_expert = 4, 2
    N, in_features, out_features = 4, 256, 256
    S = num_experts * slots_per_expert

    kx, kw, kx2, kw2 = jax.random.split(key, 4)
    x = jax.random.normal(kx, (N, S, in_features), dtype=jnp.float32)
    # Deterministic param init mirroring reset_parameters():
    #   weight ~ trunc_normal(std=0.02), bias = zeros (bias unused in forward).
    weight = 0.02 * jax.random.truncated_normal(
        kw, -2.0, 2.0, (num_experts, out_features, in_features), dtype=jnp.float32
    )
    bias = jnp.zeros((num_experts, out_features), dtype=jnp.float32)  # unused in forward

    out = expert_linear(x, weight, tile_n=2, tile_c=128, tile_o=128)
    out = jax.block_until_ready(out)
    ref = _reference(x, weight)
    assert out.shape == (N, S, out_features)
    assert jnp.allclose(out, ref, atol=1e-3, rtol=1e-3), float(
        jnp.max(jnp.abs(out - ref))
    )

    # --- Case 2: slots_per_expert = 1 (common SoftMoE config, fast 2-D path),
    # auto-picked tiles. ---
    num_experts1, slots1 = 4, 1
    S1 = num_experts1 * slots1
    x1 = jax.random.normal(kx2, (N, S1, in_features), dtype=jnp.float32)
    weight1 = 0.02 * jax.random.truncated_normal(
        kw2, -2.0, 2.0, (num_experts1, out_features, in_features), dtype=jnp.float32
    )
    out1 = jax.block_until_ready(expert_linear(x1, weight1))
    ref1 = _reference(x1, weight1)
    assert out1.shape == (N, S1, out_features)
    assert jnp.allclose(out1, ref1, atol=1e-3, rtol=1e-3), float(
        jnp.max(jnp.abs(out1 - ref1))
    )

    print("KERNEL_OK")
</pallas_src>

<mosaic_0001>
module attributes {stable_mosaic.version = 11 : i64} {
  func.func @_expert_linear_kernel(%arg0: i32, %arg1: i32, %arg2: i32, %arg3: i32, %arg4: memref<2x1x2x128xf32, #tpu.memory_space<vmem>>, %arg5: memref<1x128x128xf32, #tpu.memory_space<vmem>>, %arg6: memref<2x1x2x128xf32, #tpu.memory_space<vmem>>, %arg7: memref<2x2x128xf32, #tpu.memory_space<vmem>>) attributes {dimension_semantics = [#tpu.dimension_semantics<parallel>, #tpu.dimension_semantics<parallel>, #tpu.dimension_semantics<parallel>, #tpu.dimension_semantics<arbitrary>], iteration_bounds = array<i64: 4, 2, 2, 2>, scalar_prefetch = 0 : i64, scratch_operands = 1 : i64, tpu.core_type = #tpu.core_type<tc>, window_params = [{transform_indices = @transform_0, window_bounds = array<i64: 2, 1, 2, 128>}, {transform_indices = @transform_1, window_bounds = array<i64: 1, 128, 128>}, {transform_indices = @transform_2, window_bounds = array<i64: 2, 1, 2, 128>}]} {
    %c0_i32 = arith.constant 0 : i32
    %0 = arith.cmpi eq, %arg3, %c0_i32 : i32
    %1 = arith.extui %0 : i1 to i32
    %c0_i32_0 = arith.constant 0 : i32
    %2 = arith.cmpi ne, %1, %c0_i32_0 : i32
    scf.if %2 {
      %cst_24 = arith.constant 0.000000e+00 : f32
      %26 = vector.broadcast %cst_24 : f32 to vector<2x2x128xf32>
      %c0_25 = arith.constant 0 : index
      %c0_26 = arith.constant 0 : index
      %c0_27 = arith.constant 0 : index
      %27 = vector.load %arg7[%c0_25, %c0_26, %c0_27] : memref<2x2x128xf32, #tpu.memory_space<vmem>>, vector<2x2x128xf32>
      tpu.vector_store %arg7[%c0_25, %c0_26, %c0_27], %26 {strides = array<i32>} : memref<2x2x128xf32, #tpu.memory_space<vmem>>, vector<2x2x128xf32>,
    } else {
    }
    %c0 = arith.constant 0 : index
    %c0_1 = arith.constant 0 : index
    %c0_2 = arith.constant 0 : index
    %3 = vector.load %arg5[%c0, %c0_1, %c0_2] : memref<1x128x128xf32, #tpu.memory_space<vmem>>, vector<1x128x128xf32>
    %4 = vector.shape_cast %3 : vector<1x128x128xf32> to vector<128x128xf32>
    %c0_3 = arith.constant 0 : index
    %c0_4 = arith.constant 0 : index
    %c0_5 = arith.constant 0 : index
    %5 = vector.load %arg7[%c0_3, %c0_4, %c0_5] : memref<2x2x128xf32, #tpu.memory_space<vmem>>, vector<2x1x128xf32>
    %6 = vector.shape_cast %5 : vector<2x1x128xf32> to vector<2x128xf32>
    %c0_6 = arith.constant 0 : index
    %c0_7 = arith.constant 0 : index
    %c0_8 = arith.constant 0 : index
    %c0_9 = arith.constant 0 : index
    %7 = vector.load %arg4[%c0_6, %c0_7, %c0_8, %c0_9] : memref<2x1x2x128xf32, #tpu.memory_space<vmem>>, vector<2x1x1x128xf32>
    %8 = vector.shape_cast %7 : vector<2x1x1x128xf32> to vector<2x128xf32>
    %cst = arith.constant dense<0.000000e+00> : vector<2x128xf32>
    %9 = tpu.matmul %8, %4, %cst {dimension_numbers = #tpu.dot_dimension_numbers<[1], [0], [0], [1], [0, 0, 1, 1], [], []>} : vector<2x128xf32>, vector<128x128xf32>, vector<2x128xf32> -> vector<2x128xf32>
    %10 = arith.addf %6, %9 : vector<2x128xf32>
    %c0_10 = arith.constant 0 : index
    %c0_11 = arith.constant 0 : index
    %c0_12 = arith.constant 0 : index
    %11 = vector.load %arg7[%c0_10, %c0_11, %c0_12] : memref<2x2x128xf32, #tpu.memory_space<vmem>>, vector<2x1x128xf32>
    %12 = vector.shape_cast %11 : vector<2x1x128xf32> to vector<2x128xf32>
    %13 = vector.shape_cast %10 : vector<2x128xf32> to vector<2x1x128xf32>
    tpu.vector_store %arg7[%c0_10, %c0_11, %c0_12], %13 {strides = array<i32>} : memref<2x2x128xf32, #tpu.memory_space<vmem>>, vector<2x1x128xf32>,
    %c0_13 = arith.constant 0 : index
    %c1 = arith.constant 1 : index
    %c0_14 = arith.constant 0 : index
    %14 = vector.load %arg7[%c0_13, %c1, %c0_14] : memref<2x2x128xf32, #tpu.memory_space<vmem>>, vector<2x1x128xf32>
    %15 = vector.shape_cast %14 : vector<2x1x128xf32> to vector<2x128xf32>
    %c0_15 = arith.constant 0 : index
    %c0_16 = arith.constant 0 : index
    %c1_17 = arith.constant 1 : index
    %c0_18 = arith.constant 0 : index
    %16 = vector.load %arg4[%c0_15, %c0_16, %c1_17, %c0_18] : memref<2x1x2x128xf32, #tpu.memory_space<vmem>>, vector<2x1x1x128xf32>
    %17 = vector.shape_cast %16 : vector<2x1x1x128xf32> to vector<2x128xf32>
    %cst_19 = arith.constant dense<0.000000e+00> : vector<2x128xf32>
    %18 = tpu.matmul %17, %4, %cst_19 {dimension_numbers = #tpu.dot_dimension_numbers<[1], [0], [0], [1], [0, 0, 1, 1], [], []>} : vector<2x128xf32>, vector<128x128xf32>, vector<2x128xf32> -> vector<2x128xf32>
    %19 = arith.addf %15, %18 : vector<2x128xf32>
    %c0_20 = arith.constant 0 : index
    %c1_21 = arith.constant 1 : index
    %c0_22 = arith.constant 0 : index
    %20 = vector.load %arg7[%c0_20, %c1_21, %c0_22] : memref<2x2x128xf32, #tpu.memory_space<vmem>>, vector<2x1x128xf32>
    %21 = vector.shape_cast %20 : vector<2x1x128xf32> to vector<2x128xf32>
    %22 = vector.shape_cast %19 : vector<2x128xf32> to vector<2x1x128xf32>
    tpu.vector_store %arg7[%c0_20, %c1_21, %c0_22], %22 {strides = array<i32>} : memref<2x2x128xf32, #tpu.memory_space<vmem>>, vector<2x1x128xf32>,
    %c1_i32 = arith.constant 1 : i32
    %23 = arith.cmpi eq, %arg3, %c1_i32 : i32
    %24 = arith.extui %23 : i1 to i32
    %c0_i32_23 = arith.constant 0 : i32
    %25 = arith.cmpi ne, %24, %c0_i32_23 : i32
    scf.if %25 {
      %c0_24 = arith.constant 0 : index
      %c0_25 = arith.constant 0 : index
      %c0_26 = arith.constant 0 : index
      %26 = vector.load %arg7[%c0_24, %c0_25, %c0_26] : memref<2x2x128xf32, #tpu.memory_space<vmem>>, vector<2x2x128xf32>
      %c0_27 = arith.constant 0 : index
      %c0_28 = arith.constant 0 : index
      %c0_29 = arith.constant 0 : index
      %c0_30 = arith.constant 0 : index
      %27 = vector.load %arg6[%c0_27, %c0_28, %c0_29, %c0_30] : memref<2x1x2x128xf32, #tpu.memory_space<vmem>>, vector<2x1x2x128xf32>
      %28 = vector.shape_cast %27 : vector<2x1x2x128xf32> to vector<2x2x128xf32>
      %29 = vector.shape_cast %26 : vector<2x2x128xf32> to vector<2x1x2x128xf32>
      tpu.vector_store %arg6[%c0_27, %c0_28, %c0_29, %c0_30], %29 {strides = array<i32>} : memref<2x1x2x128xf32, #tpu.memory_space<vmem>>, vector<2x1x2x128xf32>,
    } else {
    }
    return
  }
  func.func @transform_0(%arg0: i32, %arg1: i32, %arg2: i32, %arg3: i32) -> (i32, i32, i32, i32) {
    %c0_i32 = arith.constant 0 : i32
    %c0_i32_0 = arith.constant 0 : i32
    return %arg1, %arg0, %c0_i32, %arg3 : i32, i32, i32, i32
  }
  func.func @transform_1(%arg0: i32, %arg1: i32, %arg2: i32, %arg3: i32) -> (i32, i32, i32) {
    %c0_i32 = arith.constant 0 : i32
    return %arg0, %arg3, %arg2 : i32, i32, i32
  }
  func.func @transform_2(%arg0: i32, %arg1: i32, %arg2: i32, %arg3: i32) -> (i32, i32, i32, i32) {
    %c0_i32 = arith.constant 0 : i32
    %c0_i32_0 = arith.constant 0 : i32
    return %arg1, %arg0, %c0_i32, %arg2 : i32, i32, i32, i32
  }
}

</mosaic_0001>

<bundles_post_ra>
// kernel: tpu_custom_call.1
= control target key start
LH: loop header
LB: loop body
LE: loop exit
PB: predicated region body
PF: predicated region fallthrough
CT: control target
= control target key end

     0   :  { %s1611_s0 = inlined_call_operand.hbm [shape: f32[4,4,2,256], index: 0, kind: input, shape index: {}]   ;;  %s1612_s1 = inlined_call_operand.hbm [shape: f32[4,256,256], index: 1, kind: input, shape index: {}]   ;;  %s1613_s2 = inlined_call_operand.hbm [shape: f32[4,4,2,256], index: 2, kind: output, shape index: {}]  }
   0x1   :  { %1632 = sst [smem:[#allocation27_spill]] %s1611_s0 }
   0x2   :  { %1633 = sst [smem:[#allocation28_spill]] %s1612_s1 }
   0x3   :  { %1634 = sst [smem:[#allocation29_spill]] %s1613_s2 }
   0x4   :  { %7 = vsyncpa [#allocation4], 0 }
   0x5   :  { %9 = vsyncpa [#allocation4 + $0x1], 0 }
   0x6   :  { %10 = vsyncpa [#allocation7], 0 }
   0x7   :  { %12 = vsyncpa [#allocation7 + $0x1], 0 }
   0x8   :  { %13 = vsyncpa [#allocation5], 0 }
   0x9   :  { %15 = vsyncpa [#allocation5 + $0x1], 0  ;;  %s1180_s9 = smov 0   ;;  %s1182_s10 = smov 0  }
   0xa   :  { %s1184_s11 = smov 0   ;;  %s1186_s12 = smov 0  }
   0xb   :  { %s1188_s13 = smov 0   ;;  %s1190_s14 = smov 0  }
   0xc   :  { %s1192_s15 = smov 0   ;;  %s1194_s16 = smov 0  }
   0xd   :  { %s1196_s17 = smov 0   ;;  %s1198_s18 = smov 0  }
   0xe   :  { %s1200_s19 = smov 0   ;;  %s1202_s20 = smov 0  }
   0xf   :  { %s1204_s21 = smov 0   ;;  %s1206_s22 = smov 0  }
  0x10   :  { %s1208_s23 = smov 0   ;;  %s1210_s24 = smov 0  }
  0x11   :  { %s1212_s25 = smov 0   ;;  %s1214_s26 = smov 0  }
  0x12 LB: > { %1635 = sst [smem:[#allocation12_spill]] %s1081_s9  ;;  %s605_s27 = sadd.s32 4294967295, %s1149_s26   ;;  %s1149_s26 = sphi %s1214_s26, %s21_s26   ;;  %s1145_s25 = sphi %s1212_s25, %s1706_s25   ;;  %s1141_s24 = sphi %s1210_s24, %s1693_s24   ;;  %s1137_s23 = sphi %s1208_s23, %s1705_s23   ;;  %s1133_s22 = sphi %s1206_s22, %s1704_s22   ;;  %s1129_s21 = sphi %s1204_s21, %s1703_s21   ;;  %s1125_s20 = sphi %s1202_s20, %s1690_s20   ;;  %s1121_s19 = sphi %s1200_s19, %s1702_s19   ;;  %s1117_s18 = sphi %s1198_s18, %s1689_s18   ;;  %s1113_s17 = sphi %s1196_s17, %s1701_s17   ;;  %s1109_s16 = sphi %s1194_s16, %s1688_s16   ;;  %s1105_s15 = sphi %s1192_s15, %s1687_s15   ;;  %s1101_s14 = sphi %s1190_s14, %s1700_s14   ;;  %s1097_s13 = sphi %s1188_s13, %s1699_s13   ;;  %s1093_s12 = sphi %s1186_s12, %s1698_s12   ;;  %s1089_s11 = sphi %s1184_s11, %s1697_s11   ;;  %s1085_s10 = sphi %s1182_s10, %s1696_s10   ;;  %s1081_s9 = sphi %s1180_s9, %s1694_s9  }
  0x13   : > { %1636 = sst [smem:[#allocation13_spill]] %s1109_s16  ;;  %s36_s28 = sadd.s32 1, %s1133_s22 }
  0x14   : > { %1637 = sst [smem:[#allocation14_spill]] %s1113_s17  ;;  %p1270_p0 = scmp.ge.s32.totalorder %s36_s28, 2 }
  0x15   : > { %1638 = sst [smem:[#allocation15_spill]] %s1117_s18  ;;  %p65_p1 = scmp.ne.s32.totalorder %s1113_s17, %s1109_s16 }
  0x16   : > { %1639 = sst [smem:[#allocation16_spill]] %s1121_s19  ;;  %s1708_s28 = smov (%p1270_p0, %s36_s28), 0 }
  0x17   : > { %1640 = sst [smem:[#allocation17_spill]] %s1125_s20  ;;  %p1622_p2 = scmp.eq.s32.totalorder %s1149_s26, 0 }
  0x18   : > { %1641 = sst [smem:[#allocation18_spill]] %s1129_s21  ;;  %s1286_s5 = ssub.s32 %s1133_s22, %s1708_s28 }
  0x19   : > { %1642 = sst [smem:[#allocation19_spill]] %s1133_s22  ;;  %p71_p3 = scmp.ne.s32.totalorder %s1109_s16, %s1105_s15 }
  0x1a   : > { %1643 = sst [smem:[#allocation20_spill]] %s1141_s24  ;;  %p1291_p4 = por %p1622_p2, %p65_p1 }
  0x1b   : > { %1645 = sst [smem:[#allocation21_spill]] %s1708_s28  ;;  %p1295_p5 = scmp.eq.s32.totalorder %s605_s27, 0 }
  0x1c   : > { %p1299_p6 = scmp.eq.s32.totalorder %s605_s27, 31  ;;  %p1621_p8 = scmp.lt.s32.totalorder %s1149_s26, 32 }
  0x1d   : > { %p1305_p7 = por %p1295_p5, %p71_p3  ;;  %s155_s4 = sand.u32 1, %s1113_s17  }
  0x1e   : > { %s611_s3 = sshll.u32 %s1145_s25, 1  ;;  %s609_s30 = sshll.u32 %s155_s4, 2 }
  0x1f   : > { %s1649_s15 = scalar_select %p1305_p7, 1, 0 }
  0x20   : > { %s165_s28 = sadd.s32 %s1133_s22, %s611_s3  ;;  %s632_s2 = sshll.u32 %s1141_s24, 4 }
  0x21   : > { %1650 = sst [smem:[#allocation22_spill]] %s1649_s15  ;;  %s159_s20 = scalar_lea.vmem [#allocation3], %s609_s30 }
  0x22   : > { %s170_s19 = sshll.u32 %s159_s20, 4  ;;  %s167_s21 = sadd.s32 %s632_s2, %s165_s28  ;;  %s171_s19 = int_to_ptr.vmem [resolvable:$true] %s170_s19 }
  0x23   : > { %s613_s18 = sshll.u32 %s167_s21, 5  ;;  %p1318_p9 = pnand %p1621_p8, %p1291_p4 }
  0x24   : > { %s1652_s0 = sld [smem:[#allocation27_spill]]  ;;  %p619_p10 = scmp.ge.s32.totalorder %s1149_s26, 1 }
  0x25   : > { %s156_s17 = scalar_lea.sflag [#allocation4], %s155_s4  ;;  %p915_p11 = pneg %p1318_p9 }
  0x26   : > { %s926_s30 = scalar_lea.vmem %s171_s19, 64  ;;  %s1151_s2 = smov [#allocation3]  }
  0x27   : > { %p927_p12 = scmp.ne.s32.totalorder %s171_s19, %s926_s30  ;;  %s931_s20 = sshll.u32 %s1151_s2, 4  ;;  %s932_s20 = int_to_ptr.vmem [resolvable:$false] %s931_s20 }
  0x28   : > { %s933_s21 = scalar_lea.vmem %s932_s20, 128  ;;  %p934_p3 = scmp.lt.s32.totalorder %s171_s19, %s932_s20 }
  0x29   : > { %p929_p13 = pnand %p927_p12, %p915_p11  ;;  %p935_p4 = scmp.lt.s32.totalorder %s933_s21, %s926_s30 }
  0x2a   : > { %s169_s15 = scalar_lea.hbm %s1652_s0, %s613_s18 }
  0x2b   : > { %p930_p1 = pneg %p929_p13  ;;  %p936_p8 = por %p935_p4, %p934_p3 }
  0x2d   : > { %p937_p2 = pnand %p936_p8, %p930_p1 }
  0x2f   : > { %940 = shalt.err (!%p937_p2)
}
  0x30   : > { %s1623_s1 = smov 256   ;;  %s1153_s16 = smov 32  }
  0x31   : > { %s1154_s18 = smov 2   ;;  %p203_p2 = scmp.lt.s32.totalorder %s1149_s26, 33 }
  0x32   : > { %748 = dma.hbm_to_vmem [thread:$0]  (!%p1318_p9), %s169_s15, 64, %s171_s19, %s156_s17, %s1623_s1, %s1153_s16, %s1154_s18  }
  0x33   : > { %p1334_p8 = pnand %p619_p10, %p203_p2  ;;  %s606_s3 = sadd.s32 4294967294, %s1149_s26  }
  0x34   : > { %s39_s4 = sadd.s32 1, %s1137_s23  ;;  %p95_p11 = scmp.ne.s32.totalorder %s1101_s14, %s1097_s13 }
  0x35   : > { %s1710_s4 = smov (!%p1270_p0, %s39_s4), %s1137_s23  ;;  %p101_p12 = scmp.ne.s32.totalorder %s1097_s13, %s1093_s12 }
  0x36   : > { %p41_p9 = scmp.ge.s32.totalorder %s1710_s4, 2  ;;  %p1654_p13 = scmp.eq.s32.totalorder %s1149_s26, 0 }
  0x37   : > { %s1657_s29 = sadd.s32 1, %s1141_s24  ;;  %p1364_p0 = por %p101_p12, %p1295_p5 }
  0x38   : > { %p1350_p1 = por %p95_p11, %p1654_p13  ;;  %s1712_s4 = smov (%p41_p9, %s1710_s4), 0 }
  0x39   : > { %1656 = sst [smem:[#allocation23_spill]] %s1712_s4  ;;  %s1714_s29 = smov (!%p41_p9, %s1657_s29), %s1141_s24 }
  0x3a   : > { %s84_s15 = ssub.s32 %s1137_s23, %s1712_s4  ;;  %p45_p10 = scmp.ge.s32.totalorder %s1714_s29, 2 }
  0x3b   : > { %p128_p3 = scmp.ne.s32.totalorder %s1089_s11, %s1085_s10  ;;  %p134_p4 = scmp.ne.s32.totalorder %s1085_s10, %s1081_s9 }
  0x3c   : > { %p135_p2 = scmp.eq.s32.totalorder %s606_s3, 31  ;;  %s1716_s29 = smov (%p45_p10, %s1714_s29), 0 }
  0x3d   : > { %1659 = sst [smem:[#allocation24_spill]] %s1716_s29  ;;  %s1660_s12 = sadd.s32 1, %s1145_s25 }
  0x3e   : > { %s1718_s12 = smov (!%p45_p10, %s1660_s12), %s1145_s25  ;;  %s51_s30 = ssub.s32 %s1141_s24, %s1716_s29 }
  0x3f   : > { %p1381_p11 = por %p1299_p6, %p128_p3  ;;  %s1662_s2 = sld [smem:[#allocation14_spill]] }
  0x40   : > { %p49_p5 = scmp.ge.s32.totalorder %s1718_s12, 4  ;;  %p1385_p9 = por %p135_p2, %p134_p4 }
  0x41   : > { %s1661_s7 = scalar_select %p1381_p11, 1, 0 }
  0x42   : > { %s1663_s20 = scalar_select %p1385_p9, 1, 0 }
  0x43   : > { %s180_s21 = sand.u32 1, %s1101_s14   ;;  %s633_s16 = sshll.u32 %s1133_s22, 5 }
  0x44   : > { %1664 = sst [smem:[#allocation25_spill]] %s1663_s20  ;;  %s1720_s12 = smov (%p49_p5, %s1718_s12), 0 }
  0x45   : > { %1665 = sst [smem:[#allocation26_spill]] %s1720_s12  ;;  %s614_s8 = sshll.u32 %s180_s21, 7 }
  0x46   : > { %s52_s18 = ssub.s32 %s1145_s25, %s1720_s12  ;;  %s190_s29 = sadd.s32 %s1137_s23, %s633_s16 }
  0x47   : > { %s53_s3 = sor.u32 %s52_s18, %s51_s30  ;;  %s83_s1 = sor.u32 %s1286_s5, %s52_s18 }
  0x48   : > { %s55_s19 = sor.u32 %s1286_s5, %s53_s3  ;;  %s85_s6 = sor.u32 %s84_s15, %s83_s1 }
  0x49   : > { %p56_p6 = scmp.eq.s32.totalorder %s55_s19, 0  ;;  %p86_p12 = scmp.eq.s32.totalorder %s85_s6, 0 }
  0x4a   : > { %s115_s0 = sor.u32 %s84_s15, %s53_s3  ;;  %s1666_s4 = sadd.s32 1, %s1662_s2 }
  0x4b   : > { %s1722_s2 = smov (!%p56_p6, %s1662_s2), %s1666_s4  ;;  %s1667_s24 = sadd.s32 1, %s1101_s14 }
  0x4c   : > { %s1406_s22 = scalar_select %p86_p12, %s1101_s14, %s1667_s24  }
  0x4d   : > { %p116_p13 = scmp.eq.s32.totalorder %s115_s0, 0  ;;  %s617_s12 = sshll.u32 %s1145_s25, 6 }
  0x4e   : > { %s192_s20 = sadd.s32 %s617_s12, %s190_s29  ;;  %s184_s9 = scalar_lea.vmem [#allocation6], %s614_s8 }
  0x4f   : > { %s195_s30 = sshll.u32 %s184_s9, 4  ;;  %s1668_s18 = sadd.s32 1, %s1089_s11  ;;  %s196_s30 = int_to_ptr.vmem [resolvable:$true] %s195_s30 }
  0x50   : > { %s1412_s5 = scalar_select %p116_p13, %s1089_s11, %s1668_s18  }
  0x51   : > { %s618_s1 = sshll.u32 %s192_s20, 7  ;;  %s1669_s15 = sld [smem:[#allocation28_spill]] }
  0x52   : > { %p1670_p10 = scmp.lt.s32.totalorder %s1149_s26, 32  ;;  %s181_s0 = scalar_lea.sflag [#allocation7], %s180_s21 }
  0x53   : > { %s954_s9 = scalar_lea.vmem %s196_s30, 2048  ;;  %s1155_s24 = smov [#allocation6]  }
  0x54   : > { %p1421_p3 = pnand %p1670_p10, %p1350_p1  ;;  %p955_p2 = scmp.ne.s32.totalorder %s196_s30, %s954_s9 }
  0x55   : > { %s959_s29 = sshll.u32 %s1155_s24, 4  ;;  %s960_s29 = int_to_ptr.vmem [resolvable:$false] %s959_s29 }
  0x56   : > { %p943_p4 = pneg %p1421_p3  ;;  %s961_s12 = scalar_lea.vmem %s960_s29, 4096 }
  0x57   : > { %s194_s16 = scalar_lea.hbm %s1669_s15, %s618_s1  ;;  %p962_p12 = scmp.lt.s32.totalorder %s196_s30, %s960_s29 }
  0x58   : > { %p957_p5 = pnand %p955_p2, %p943_p4  ;;  %p963_p13 = scmp.lt.s32.totalorder %s961_s12, %s954_s9 }
  0x5a   : > { %p958_p6 = pneg %p957_p5  ;;  %p964_p9 = por %p963_p13, %p962_p12 }
  0x5c   : > { %p965_p11 = pnand %p964_p9, %p958_p6 }
  0x5e   : > { %968 = shalt.err (!%p965_p11)
}
  0x5f   : > { %s1156_s17 = smov 128   ;;  %s1157_s20 = smov 8  }
  0x60   : > { %s1672_s21 = smov 256   ;;  %207 = sbr.rel (%p1334_p8) target bundleno = 398 (0x18e), region = 28 }
  0x61   : > { %751 = dma.hbm_to_vmem [thread:$0]  (!%p1421_p3), %s194_s16, 2048, %s196_s30, %s181_s0, %s1672_s21, %s1156_s17, %s1157_s20  }
  0x62   : > { %s1673_s8 = sld [smem:[#allocation13_spill]] (!%p1334_p8) }
  0x68   : > { %s209_s18 = sand.u32 1, %s1673_s8  }
  0x69   : > { %s620_s1 = sshll.u32 %s209_s18, 2  ;;  %s210_s19 = scalar_lea.sflag [#allocation4], %s209_s18 }
  0x6a   : > { %s1433_s6 = scalar_lea.vmem [#allocation3], %s620_s1 }
  0x6b   : > { %1068 = dma.done.wait (%p1305_p7), %s210_s19, 64  }
  0x6c   : > { %1070 = vsyncadd (%p1305_p7), %s210_s19, 4294967232  ;;  %s218_s15 = sand.u32 1, %s1097_s13  }
  0x6d   : > { %s621_s4 = sshll.u32 %s218_s15, 7  ;;  %s219_s30 = scalar_lea.sflag [#allocation7], %s218_s15 }
  0x6e   : > { %s1440_s16 = scalar_lea.vmem [#allocation6], %s621_s4 }
  0x6f   : > { %1072 = dma.done.wait (%p1364_p0), %s219_s30, 2048  }
  0x70   : > { %1074 = vsyncadd (%p1364_p0), %s219_s30, 4294965248  ;;  %s245_s28 = sand.u32 1, %s1085_s10   ;;  %s1675_s24 = sld [smem:[#allocation15_spill]] }
  0x71   : > { %s1449_s0 = sshll.u32 %s245_s28, 2 }
  0x72   : > { %s247_s9 = scalar_lea.vmem [#allocation8], %s1449_s0 }
  0x76   : > { %p623_p7 = scmp.ne.s32.totalorder %s1675_s24, 0 }
  0x78   : > { %254 = sbr.rel (%p623_p7) target bundleno = 127 (0x7f), region = 40 }
  0x7d   : > { %v1158_v0 = vmov 0.0  }
  0x7e   : > { %255 = vst [vmem:[#allocation2] sm:$0x3] %v1158_v0  ;;  %256 = vst [vmem:[#allocation2 + $0x2] sm:$0x3] %v1158_v0 }
  0x7f PF: > { %v272_v1 = vld [vmem:[%s1440_s16 + $0x78] sm:$0xff]  ;;  %v1159_v2 = vmov 0.0   ;;  %v271_v3 = vld [vmem:[%s1440_s16 + $0x70] sm:$0xff]  ;;  %v270_v4 = vld [vmem:[%s1440_s16 + $0x68] sm:$0xff]  ;;  %vm280_vm0 = vcmask 1041409   ;;  %vm1160_vm1 = vmmov 0  }
  0x80   : > { %669 = vmatprep.subr.mxu0 %v1159_v2  ;;  %704 = vmatprep.subr.mxu1 %v1159_v2  ;;  %v269_v5 = vld [vmem:[%s1440_s16 + $0x60] sm:$0xff]  ;;  %v268_v6 = vld [vmem:[%s1440_s16 + $0x58] sm:$0xff]  ;;  %v267_v7 = vld [vmem:[%s1440_s16 + $0x50] sm:$0xff]  ;;  %s1676_s27 = sld [smem:[#allocation15_spill]] }
  0x81   : > { %670 = vmatpush3.msra.mxu0 %v272_v1  ;;  %705 = vmatpush3.msra.mxu1 %v272_v1  ;;  %v266_v8 = vld [vmem:[%s1440_s16 + $0x48] sm:$0xff]  ;;  %v265_v9 = vld [vmem:[%s1440_s16 + $0x40] sm:$0xff]  ;;  %v264_v10 = vld [vmem:[%s1440_s16 + $0x38] sm:$0xff] }
  0x82   : > { %671 = vmatprep.subr.mxu0 %v1159_v2  ;;  %706 = vmatprep.subr.mxu1 %v1159_v2  ;;  %v263_v11 = vld [vmem:[%s1440_s16 + $0x30] sm:$0xff]  ;;  %v262_v12 = vld [vmem:[%s1440_s16 + $0x28] sm:$0xff]  ;;  %v261_v13 = vld [vmem:[%s1440_s16 + $0x20] sm:$0xff] }
  0x83   : > { %672 = vmatpush3.msra.mxu0 %v271_v3  ;;  %707 = vmatpush3.msra.mxu1 %v271_v3  ;;  %v260_v14 = vld [vmem:[%s1440_s16 + $0x18] sm:$0xff]  ;;  %v259_v17 = vld [vmem:[%s1440_s16 + $0x10] sm:$0xff]  ;;  %v258_v18 = vld [vmem:[%s1440_s16 + $0x8] sm:$0xff] }
  0x84   : > { %673 = vmatprep.subr.mxu0 %v1159_v2  ;;  %708 = vmatprep.subr.mxu1 %v1159_v2  ;;  %v276_v15 = vld [vmem:[%s1433_s6 + $0x2] sm:$0x1]  ;;  %v364_v16 = vld [vmem:[%s1433_s6 + $0x3] sm:$0x1]  ;;  %v275_v21 = vld [vmem:[%s1433_s6] sm:$0x1] }
  0x85   : > { %674 = vmatpush3.msra.mxu0 %v270_v4  ;;  %709 = vmatpush3.msra.mxu1 %v270_v4  ;;  %v279_v19 = vrot.slane %v276_v15, 7  ;;  %v367_v20 = vrot.slane %v364_v16, 7  ;;  %v363_v22 = vld [vmem:[%s1433_s6 + $0x1] sm:$0x1]  ;;  %v257_v23 = vld [vmem:[%s1440_s16] sm:$0xff] }
  0x86   : > { %675 = vmatprep.subr.mxu0 %v1159_v2  ;;  %710 = vmatprep.subr.mxu1 %v1159_v2  ;;  %v273_v26 = vld [vmem:[#allocation2] sm:$0x1]  ;;  %v361_v27 = vld [vmem:[#allocation2 + $0x1] sm:$0x1]  ;;  %v274_v28 = vld [vmem:[#allocation2 + $0x2] sm:$0x1] }
  0x87   : > { %676 = vmatpush3.msra.mxu0 %v269_v5  ;;  %711 = vmatpush3.msra.mxu1 %v269_v5  ;;  %v281_v24 = vsel %vm280_vm0, %v279_v19, %v275_v21  ;;  %v368_v25 = vsel %vm280_vm0, %v367_v20, %v363_v22  ;;  %v362_v30 = vld [vmem:[#allocation2 + $0x3] sm:$0x1]  ;;  %p624_p8 = scmp.ne.s32.totalorder %s1676_s27, 1 }
  0x88   : > { %677 = vmatprep.subr.mxu0 %v1159_v2  ;;  %712 = vmatprep.subr.mxu1 %v1159_v2 }
  0x89   : > { %678 = vmatpush3.msra.mxu0 %v268_v6  ;;  %713 = vmatpush3.msra.mxu1 %v268_v6 }
  0x8a   : > { %679 = vmatprep.subr.mxu0 %v1159_v2  ;;  %714 = vmatprep.subr.mxu1 %v1159_v2 }
  0x8b   : > { %680 = vmatpush3.msra.mxu0 %v267_v7  ;;  %715 = vmatpush3.msra.mxu1 %v267_v7 }
  0x8c   : > { %681 = vmatprep.subr.mxu0 %v1159_v2  ;;  %716 = vmatprep.subr.mxu1 %v1159_v2 }
  0x8d   : > { %682 = vmatpush3.msra.mxu0 %v266_v8  ;;  %717 = vmatpush3.msra.mxu1 %v266_v8 }
  0x8e   : > { %683 = vmatprep.subr.mxu0 %v1159_v2  ;;  %718 = vmatprep.subr.mxu1 %v1159_v2 }
  0x8f   : > { %684 = vmatpush3.msra.mxu0 %v265_v9  ;;  %719 = vmatpush3.msra.mxu1 %v265_v9 }
  0x90   : > { %685 = vmatprep.subr.mxu0 %v1159_v2  ;;  %720 = vmatprep.subr.mxu1 %v1159_v2 }
  0x91   : > { %686 = vmatpush3.msra.mxu0 %v264_v10  ;;  %721 = vmatpush3.msra.mxu1 %v264_v10 }
  0x92   : > { %687 = vmatprep.subr.mxu0 %v1159_v2  ;;  %722 = vmatprep.subr.mxu1 %v1159_v2 }
  0x93   : > { %688 = vmatpush3.msra.mxu0 %v263_v11  ;;  %723 = vmatpush3.msra.mxu1 %v263_v11 }
  0x94   : > { %689 = vmatprep.subr.mxu0 %v1159_v2  ;;  %724 = vmatprep.subr.mxu1 %v1159_v2 }
  0x95   : > { %690 = vmatpush3.msra.mxu0 %v262_v12  ;;  %725 = vmatpush3.msra.mxu1 %v262_v12 }
  0x96   : > { %691 = vmatprep.subr.mxu0 %v1159_v2  ;;  %726 = vmatprep.subr.mxu1 %v1159_v2 }
  0x97   : > { %692 = vmatpush3.msra.mxu0 %v261_v13  ;;  %727 = vmatpush3.msra.mxu1 %v261_v13 }
  0x98   : > { %693 = vmatprep.subr.mxu0 %v1159_v2  ;;  %728 = vmatprep.subr.mxu1 %v1159_v2 }
  0x99   : > { %694 = vmatpush3.msra.mxu0 %v260_v14  ;;  %729 = vmatpush3.msra.mxu1 %v260_v14 }
  0x9a   : > { %695 = vmatprep.subr.mxu0 %v1159_v2  ;;  %730 = vmatprep.subr.mxu1 %v1159_v2 }
  0x9b   : > { %696 = vmatpush3.msra.mxu0 %v259_v17  ;;  %731 = vmatpush3.msra.mxu1 %v259_v17 }
  0x9c   : > { %697 = vmatprep.subr.mxu0 %v1159_v2  ;;  %732 = vmatprep.subr.mxu1 %v1159_v2 }
  0x9d   : > { %698 = vmatpush3.msra.mxu0 %v258_v18  ;;  %733 = vmatpush3.msra.mxu1 %v258_v18 }
  0x9e   : > { %699 = vmatprep.subr.mxu0 %v1159_v2  ;;  %734 = vmatprep.subr.mxu1 %v1159_v2 }
  0x9f   : > { %700 = vmatpush3.msra.mxu0 %v257_v23  ;;  %701 = vmatprep.mubr.msk.f32.mxu0 %vm1160_vm1, %v1159_v2 }
  0xa0   : > { %735 = vmatpush3.msra.mxu1 %v257_v23  ;;  %736 = vmatprep.mubr.msk.f32.mxu1 %vm1160_vm1, %v1159_v2 }
  0xa1   : > { %702 = vmatmul.mubr.f32.vlgmr.msra.gmra.mxu0 %v281_v24  ;;  %737 = vmatmul.mubr.f32.vlgmr.msra.gmra.mxu1 %v368_v25 }
 0x161   : > { %v349_v29 = vpop.f32.mrf.mxu0  ;;  %v436_v31 = vpop.f32.mrf.mxu1 }
 0x162   : > { %v354_v32 = vrot.slane %v349_v29, 1  ;;  %v357_v33 = vadd.f32 %v349_v29, %v273_v26  ;;  %v441_v34 = vrot.slane %v436_v31, 1  ;;  %v444_v35 = vadd.f32 %v436_v31, %v361_v27  ;;  %451 = sbr.rel (%p624_p8) target bundleno = 367 (0x16f), region = 44 }
 0x163   : > { %v703_v36 = vpop.f32.mrf.mxu0  ;;  %v738_v37 = vpop.f32.mrf.mxu1 }
 0x164   : > { %v358_v38 = vadd.f32 %v354_v32, %v274_v28  ;;  %359 = vst [vmem:[#allocation2] sm:$0x1] %v357_v33  ;;  %v445_v39 = vadd.f32 %v441_v34, %v362_v30  ;;  %446 = vst [vmem:[#allocation2 + $0x1] sm:$0x1] %v444_v35 }
 0x166   : > { %360 = vst [vmem:[#allocation2 + $0x2] sm:$0x1] %v358_v38  ;;  %447 = vst [vmem:[#allocation2 + $0x3] sm:$0x1] %v445_v39 }
 0x16d   : > { %v452_v40 = vld [vmem:[#allocation2] sm:$0xf]  }
 0x16e   : > { %454 = vst [vmem:[%s247_s9] sm:$0xf] %v452_v40  }
 0x16f PF: > { %s1677_s29 = sld [smem:[#allocation18_spill]]  ;;  %s474_s18 = sshll.u32 %s247_s9, 4  ;;  %s1515_s18 = int_to_ptr.vmem [resolvable:$true] %s474_s18 }
 0x170   : > { %s1678_s12 = sld [smem:[#allocation16_spill]]  ;;  %s1524_s16 = scalar_lea.sflag [#allocation5], %s245_s28 }
 0x171   : > { %s1679_s17 = sld [smem:[#allocation17_spill]]  ;;  %s969_s24 = scalar_lea.vmem %s1515_s18, 64 }
 0x172   : > { %s1680_s15 = sld [smem:[#allocation29_spill]]  ;;  %p970_p1 = scmp.ne.s32.totalorder %s1515_s18, %s969_s24 }
 0x173   : > { %p1682_p0 = scmp.ne.s32.totalorder %s1661_s7, 0  ;;  %s1161_s0 = smov [#allocation8]  }
 0x174   : > { %s973_s9 = sshll.u32 %s1161_s0, 4  ;;  %s974_s9 = int_to_ptr.vmem [resolvable:$false] %s973_s9 }
 0x175   : > { %s627_s20 = sshll.u32 %s1677_s29, 1  ;;  %p971_p11 = pnand %p970_p1, %p1682_p0 }
 0x176   : > { %s469_s21 = sadd.s32 %s1678_s12, %s627_s20  ;;  %s975_s27 = scalar_lea.vmem %s974_s9, 128 }
 0x177   : > { %s634_s8 = sshll.u32 %s1679_s17, 4  ;;  %p972_p9 = pneg %p971_p11 }
 0x178   : > { %s471_s3 = sadd.s32 %s634_s8, %s469_s21  ;;  %s1681_s4 = smov %s1680_s15 }
 0x179   : > { %s629_s1 = sshll.u32 %s471_s3, 5  ;;  %p976_p10 = scmp.lt.s32.totalorder %s1515_s18, %s974_s9 }
 0x17a   : > { %s1520_s30 = scalar_lea.hbm %s1680_s15, %s629_s1  ;;  %p977_p3 = scmp.lt.s32.totalorder %s975_s27, %s969_s24 }
 0x17c   : > { %p978_p4 = por %p977_p3, %p976_p10 }
 0x17e   : > { %p979_p2 = pnand %p978_p4, %p972_p9 }
 0x180   : > { %982 = shalt.err (!%p979_p2)
}
 0x181   : > { %s983_s28 = scalar_lea.hbm %s1520_s30, 64  ;;  %s987_s17 = scalar_lea.hbm %s1681_s4, 1024 }
 0x182   : > { %p984_p5 = scmp.ne.s32.totalorder %s1520_s30, %s983_s28  ;;  %p988_p13 = scmp.lt.s32.totalorder %s1520_s30, %s1681_s4 }
 0x183   : > { %p989_p7 = scmp.lt.s32.totalorder %s987_s17, %s983_s28 }
 0x184   : > { %p985_p6 = pnand %p984_p5, %p1682_p0 }
 0x185   : > { %p990_p8 = por %p989_p7, %p988_p13 }
 0x186   : > { %p986_p12 = pneg %p985_p6 }
 0x188   : > { %p991_p1 = pnand %p990_p8, %p986_p12 }
 0x18a   : > { %994 = shalt.err (!%p991_p1)
}
 0x18b   : > { %s1162_s8 = smov 32   ;;  %s1163_s3 = smov 256  }
 0x18c   : > { %s1164_s1 = smov 2  }
 0x18d   : > { %743 = dma.vmem_to_hbm [thread:$0]  (%p1682_p0), %s1515_s18, 64, %s1520_s30, %s1524_s16, %s1162_s8, %s1163_s3, %s1164_s1  }
 0x18e PF: > { %s1683_s19 = sld [smem:[#allocation12_spill]]  ;;  %p757_p11 = scmp.ge.s32.totalorder %s1149_s26, 2 }
 0x18f   : > { %s1684_s6 = sld [smem:[#allocation25_spill]] }
 0x194   : > { %s489_s15 = sand.u32 1, %s1683_s19  }
 0x195   : > { %p1685_p9 = scmp.ne.s32.totalorder %s1684_s6, 0  ;;  %s490_s24 = scalar_lea.sflag [#allocation5], %s489_s15 }
 0x197   : > { %p753_p10 = pnand %p757_p11, %p1685_p9 }
 0x199   : > { %p754_p3 = pneg %p753_p10 }
 0x19b   : > { %1076 = dma.done.wait (%p754_p3), %s490_s24, 64  }
 0x19c   : > { %1078 = vsyncadd (%p754_p3), %s490_s24, 4294967232  ;;  %s21_s26 = sadd.s32 1, %s1149_s26   ;;  %s1687_s15 = sld [smem:[#allocation13_spill]] }
 0x19d   : > { %p1552_p4 = scmp.ge.s32.totalorder %s21_s26, 34   ;;  %s1688_s16 = sld [smem:[#allocation14_spill]] }
 0x19e   : > { %s1689_s18 = sld [smem:[#allocation19_spill]]  ;;  %s1694_s9 = smov %s1085_s10 }
 0x19f   : > { %s1690_s20 = sld [smem:[#allocation20_spill]]  ;;  %s1696_s10 = smov %s1089_s11 }
 0x1a0   : > { %s1691_s7 = sld [smem:[#allocation21_spill]]  ;;  %s1697_s11 = smov %s1412_s5 }
 0x1a1   : > { %s1692_s30 = sld [smem:[#allocation23_spill]]  ;;  %s1698_s12 = smov %s1097_s13 }
 0x1a2   : > { %s1693_s24 = sld [smem:[#allocation24_spill]]  ;;  %s1699_s13 = smov %s1101_s14 }
 0x1a3   : > { %s1695_s27 = sld [smem:[#allocation26_spill]]  ;;  %s1700_s14 = smov %s1406_s22 }
 0x1a4   : > { %s1701_s17 = smov %s1722_s2  ;;  %s1702_s19 = smov %s1137_s23 }
 0x1a5   : > { %s1703_s21 = smov %s1145_s25  ;;  %20 = sbr.rel (!%p1552_p4) target bundleno = 18 (0x12), region = 94 }
 0x1a6   : > { %s1704_s22 = smov %s1691_s7 }
 0x1a7   : > { %s1705_s23 = smov %s1692_s30 }
 0x1a9   : > { %s1706_s25 = smov %s1695_s27 }
 0x1aa   :  { %495 = vsyncpa [#allocation4], 1 }
 0x1ab   :  { %497 = vsyncpa [#allocation4 + $0x1], 1 }
 0x1ac   :  { %498 = vsyncpa [#allocation7], 1 }
 0x1ad   :  { %500 = vsyncpa [#allocation7 + $0x1], 1 }
 0x1ae   :  { %501 = vsyncpa [#allocation5], 1 }
 0x1af   :  { %503 = vsyncpa [#allocation5 + $0x1], 1 }

</bundles_post_ra>
